<compile_context>
chip_gen: v6e
topology: v6e:2x2x1
jax: 0.10.0
libtpu: 0.0.40
codegen_flags: <defaults>
</compile_context>

<pallas_src>
from functools import partial

import jax
import jax.numpy as jnp
from jax.experimental import pallas as pl
from jax.experimental.pallas import tpu as pltpu


def _s2d_copy_kernel(x_ref, o_ref):
    # x_ref: (1, 1, C, 1, TH, Wb) -- one (b_w, b_h) plane of a TH-row tile
    # o_ref: (1, C, TH, Wb)       -- its NCHW channel-group destination
    # Pure copy: the entire space-to-depth permutation is carried by the
    # BlockSpec index maps (DMA addressing), not by vector work.
    o_ref[0, :, :, :] = x_ref[0, 0, :, 0, :, :]


def _sublane(dtype):
    # Second-to-last-dim packing granularity: 8 for 32-bit, 16 for 16-bit,
    # 32 for 8-bit dtypes.
    return max(8, 32 // jnp.dtype(dtype).itemsize)


def _vmem_capacity_bytes():
    try:
        return int(pltpu.get_tpu_info().vmem_capacity_bytes)
    except Exception:
        return 64 * 1024 * 1024  # conservative (v7x-sized) fallback


def _pick_row_tile(hb, row_bytes, budget, sublane):
    """Rows of the reduced image per block.

    Returns either the full extent `hb` or a multiple of `sublane`, so the
    (sublane, 128) layout rule on the block's second-to-last dim always holds.
    The result does not have to divide `hb` (ragged last tile via pl.cdiv).
    """
    max_th = max(1, min(hb, budget // max(row_bytes, 1)))
    if max_th >= hb or hb <= sublane:
        return hb
    th = max(sublane, (max_th // sublane) * sublane)
    # Prefer an exact divisor of hb (no ragged tail) if one exists nearby.
    for cand in range(th, 0, -sublane):
        if cand * 2 < th:
            break
        if hb % cand == 0:
            return cand
    return th


def space_to_depth(x, block_size):
    """Space-to-depth, DCR mode. NCHW in / NCHW out, matching the torch module."""
    B, C, H, W = x.shape
    b = int(block_size)
    if H % b != 0 or W % b != 0:
        raise ValueError(f"Expecting H and W divisible by {b}, got H={H}, W={W}")
    Hb, Wb = H // b, W // b

    itemsize = jnp.dtype(x.dtype).itemsize
    sublane = _sublane(x.dtype)

    # Per-generation tile budget: double-buffered in + out tiles = 4x a block.
    vmem_cap = _vmem_capacity_bytes()
    usable = max(32 * 1024 * 1024, vmem_cap - (16 << 20))
    tile_budget = int(min(16 << 20, max(2 << 20, usable // 4)))

    TH = _pick_row_tile(Hb, C * Wb * itemsize, tile_budget, sublane)
    n_h = pl.cdiv(Hb, TH)
    block_bytes = C * TH * Wb * itemsize

    cap_limit = max(32 << 20, vmem_cap - (8 << 20))   # never exceed physical VMEM
    vmem_limit = int(min(cap_limit, max(32 << 20, 4 * block_bytes + (4 << 20))))

    # Single remaining XLA relayout: NCHW -> (B, b_w, C, b_h, Hb, Wb), i.e.
    # xv[n, bw, c, bh, i, j] == x[n, c, i*b + bh, j*b + bw].
    # TODO(synk): a fully fused single-pass NCHW->NCHW kernel (2 HBM passes)
    # needs stride-b lane gathers inside the kernel; left out for lowering
    # robustness.
    x6 = x.reshape(B, C, Hb, b, Wb, b)
    xv = jnp.transpose(x6, (0, 5, 1, 3, 2, 4))

    out = pl.pallas_call(
        _s2d_copy_kernel,
        grid=(B, n_h, b, b),
        in_specs=[
            pl.BlockSpec((1, 1, C, 1, TH, Wb),
                         lambda n, h, bh, bw: (n, bw, 0, bh, h, 0)),
        ],
        # Output is written directly in NCHW; channel-block index bh*b + bw
        # selects the DCR channel group (bh*b*C + bw*C + c).
        out_specs=pl.BlockSpec((1, C, TH, Wb),
                               lambda n, h, bh, bw: (n, bh * b + bw, h, 0)),
        out_shape=jax.ShapeDtypeStruct((B, b * b * C, Hb, Wb), x.dtype),
        compiler_params=pltpu.CompilerParams(
            dimension_semantics=("parallel", "parallel", "parallel", "parallel"),
            vmem_limit_bytes=vmem_limit),
        cost_estimate=pl.CostEstimate(
            flops=0, transcendentals=0,
            bytes_accessed=2 * B * C * H * W * itemsize),
    )(xv)
    return out


class SpaceToDepth:
    """JAX/Pallas equivalent of the torch SpaceToDepth module (no parameters)."""
    # TODO(synk): the autograd backward (depth-to-space) of the torch Function
    # is not implemented; only the forward pass is provided.

    def __init__(self, block_size: int):
        self.block_size = int(block_size)
        self._fn = jax.jit(partial(space_to_depth, block_size=self.block_size))

    def __call__(self, x):
        return self._fn(x)


def _space_to_depth_ref(x, b):
    """Pure-JAX reference mirroring the torch implementation exactly."""
    B, C, H, W = x.shape
    y = x.reshape(B, C, H // b, b, W // b, b)
    y = jnp.transpose(y, (0, 3, 5, 1, 2, 4))
    return y.reshape(B, C * b * b, H // b, W // b)


if __name__ == "__main__":
    key = jax.random.PRNGKey(0)

    # Case 1: the canonical small shape.
    B, C, H, W = 2, 4, 16, 16
    block_size = 2
    x = jax.random.normal(key, (B, C, H, W), dtype=jnp.float32)

    mod = SpaceToDepth(block_size)
    out = jax.block_until_ready(mod(x))
    ref = _space_to_depth_ref(x, block_size)
    assert out.shape == (B, C * block_size ** 2, H // block_size, W // block_size)
    assert out.dtype == x.dtype
    assert jnp.array_equal(out, ref), "Pallas space-to-depth mismatch vs reference (f32)"

    # Case 2: small-C / rectangular / bf16 (exercises the lane-dense-Wb layout).
    key2 = jax.random.PRNGKey(0)
    x2 = jax.random.normal(key2, (1, 3, 24, 40), dtype=jnp.bfloat16)
    out2 = jax.block_until_ready(mod(x2))
    ref2 = _space_to_depth_ref(x2, block_size)
    assert out2.shape == (1, 3 * block_size ** 2, 12, 20)
    assert out2.dtype == x2.dtype
    assert jnp.array_equal(out2, ref2), "Pallas space-to-depth mismatch vs reference (bf16)"

    print("KERNEL_OK")
</pallas_src>

<mosaic_0001>
module attributes {stable_mosaic.version = 11 : i64} {
  func.func @_s2d_copy_kernel(%arg0: i32, %arg1: i32, %arg2: i32, %arg3: i32, %arg4: memref<1x1x4x1x8x8xf32, #tpu.memory_space<vmem>>, %arg5: memref<1x4x8x8xf32, #tpu.memory_space<vmem>>) attributes {dimension_semantics = [#tpu.dimension_semantics<parallel>, #tpu.dimension_semantics<parallel>, #tpu.dimension_semantics<parallel>, #tpu.dimension_semantics<parallel>], iteration_bounds = array<i64: 2, 1, 2, 2>, scalar_prefetch = 0 : i64, scratch_operands = 0 : i64, tpu.core_type = #tpu.core_type<tc>, window_params = [{transform_indices = @transform_0, window_bounds = array<i64: 1, 1, 4, 1, 8, 8>}, {transform_indices = @transform_1, window_bounds = array<i64: 1, 4, 8, 8>}]} {
    %c0 = arith.constant 0 : index
    %c0_0 = arith.constant 0 : index
    %c0_1 = arith.constant 0 : index
    %c0_2 = arith.constant 0 : index
    %c0_3 = arith.constant 0 : index
    %c0_4 = arith.constant 0 : index
    %0 = vector.load %arg4[%c0, %c0_0, %c0_1, %c0_2, %c0_3, %c0_4] : memref<1x1x4x1x8x8xf32, #tpu.memory_space<vmem>>, vector<1x1x4x1x8x8xf32>
    %1 = vector.shape_cast %0 : vector<1x1x4x1x8x8xf32> to vector<4x8x8xf32>
    %c0_5 = arith.constant 0 : index
    %c0_6 = arith.constant 0 : index
    %c0_7 = arith.constant 0 : index
    %c0_8 = arith.constant 0 : index
    %2 = vector.load %arg5[%c0_5, %c0_6, %c0_7, %c0_8] : memref<1x4x8x8xf32, #tpu.memory_space<vmem>>, vector<1x4x8x8xf32>
    %3 = vector.shape_cast %2 : vector<1x4x8x8xf32> to vector<4x8x8xf32>
    %4 = vector.shape_cast %1 : vector<4x8x8xf32> to vector<1x4x8x8xf32>
    tpu.vector_store %arg5[%c0_5, %c0_6, %c0_7, %c0_8], %4 {strides = array<i32>} : memref<1x4x8x8xf32, #tpu.memory_space<vmem>>, vector<1x4x8x8xf32>,
    return
  }
  func.func @transform_0(%arg0: i32, %arg1: i32, %arg2: i32, %arg3: i32) -> (i32, i32, i32, i32, i32, i32) {
    %c0_i32 = arith.constant 0 : i32
    %c0_i32_0 = arith.constant 0 : i32
    %c0_i32_1 = arith.constant 0 : i32
    return %arg0, %arg3, %c0_i32, %arg2, %arg1, %c0_i32_0 : i32, i32, i32, i32, i32, i32
  }
  func.func @transform_1(%arg0: i32, %arg1: i32, %arg2: i32, %arg3: i32) -> (i32, i32, i32, i32) {
    %c2_i32 = arith.constant 2 : i32
    %0 = arith.muli %arg2, %c2_i32 : i32
    %1 = arith.addi %0, %arg3 : i32
    %c0_i32 = arith.constant 0 : i32
    %c0_i32_0 = arith.constant 0 : i32
    return %arg0, %1, %arg1, %c0_i32 : i32, i32, i32, i32
  }
}

</mosaic_0001>

<bundles_post_ra>
// kernel: space_to_depth.1
= control target key start
LH: loop header
LB: loop body
LE: loop exit
PB: predicated region body
PF: predicated region fallthrough
CT: control target
= control target key end

     0   :  { %s531_s6 = smov 0   ;;  %s533_s7 = smov 0   ;;  %s651_s0 = inlined_call_operand.vmem [shape: f32[2,2,4,2,8,8], index: 0, kind: input, shape index: {}]   ;;  %s652_s1 = inlined_call_operand.vmem [shape: f32[2,16,8,8], index: 1, kind: output, shape index: {}]  }
   0x1   :  { %s535_s8 = smov 0   ;;  %s537_s9 = smov 0  }
   0x2   :  { %s539_s10 = smov 0   ;;  %s541_s11 = smov 0  }
   0x3   :  { %s543_s12 = smov 0   ;;  %s545_s13 = smov 0  }
   0x4   :  { %s547_s14 = smov 0  }
   0x5 LB: > { %s26_s15 = sadd.s32 1, %s507_s11  ;;  %s29_s16 = sadd.s32 1, %s511_s12  ;;  %s519_s14 = sphi %s547_s14, %s11_s14   ;;  %s515_s13 = sphi %s545_s13, %s661_s13   ;;  %s511_s12 = sphi %s543_s12, %s660_s12   ;;  %s507_s11 = sphi %s541_s11, %s659_s11   ;;  %s503_s10 = sphi %s539_s10, %s658_s10   ;;  %s499_s9 = sphi %s537_s9, %s657_s9   ;;  %s495_s8 = sphi %s535_s8, %s656_s8   ;;  %s491_s7 = sphi %s533_s7, %s655_s7   ;;  %s487_s6 = sphi %s531_s6, %s654_s6  }
   0x6   : > { %p27_p0 = scmp.ge.s32.totalorder %s26_s15, 2  ;;  %p57_p1 = scmp.ne.s32.totalorder %s491_s7, %s487_s6 }
   0x7   : > { %p58_p2 = scmp.eq.s32.totalorder %s519_s14, 0  ;;  %s37_s17 = sadd.s32 1, %s515_s13 }
   0x8   : > { %s663_s16 = smov (!%p27_p0, %s29_s16), %s511_s12  ;;  %s665_s15 = smov (%p27_p0, %s26_s15), 0 }
   0x9   : > { %p31_p3 = scmp.ge.s32.totalorder %s663_s16, 2  ;;  %p583_p4 = por %p58_p2, %p57_p1 }
   0xa   : > { %s42_s19 = ssub.s32 %s507_s11, %s665_s15  ;;  %s50_s24 = sadd.s32 1, %s491_s7 }
   0xb   : > { %s667_s17 = smov (!%p31_p3, %s37_s17), %s515_s13  ;;  %s669_s16 = smov (%p31_p3, %s663_s16), 0 }
   0xc   : > { %p39_p5 = scmp.ge.s32.totalorder %s667_s17, 2  ;;  %s44_s20 = ssub.s32 %s511_s12, %s669_s16 }
   0xd   : > { %p364_p7 = scmp.ge.s32.totalorder %s519_s14, 8 }
   0xe   : > { %s671_s17 = smov (%p39_p5, %s667_s17), 0 }
   0xf   : > { %s41_s21 = ssub.s32 %s515_s13, %s671_s17 }
  0x10   : > { %s43_s22 = sor.u32 %s42_s19, %s41_s21  ;;  %117 = sbr.rel (%p364_p7) target bundleno = 30 (0x1e), region = 16 }
  0x11   : > { %s45_s23 = sor.u32 %s44_s20, %s43_s22 }
  0x12   : > { %p48_p6 = scmp.eq.s32.totalorder %s45_s23, 0 }
  0x14   : > { %s602_s25 = scalar_select %p48_p6, %s491_s7, %s50_s24  }
  0x15   : > { %120 = sbr.rel (!%p583_p4) target bundleno = 30 (0x1e), region = 20  ;;  %s122_s26 = sand.u32 (%p583_p4), 1, %s491_s7  }
  0x16   : > { %s366_s27 = sshll.u32 (%p583_p4), %s507_s11, 3  ;;  %s365_s28 = sshll.u32 (%p583_p4), %s122_s26, 5 }
  0x17   : > { %s127_s29 = sadd.s32 (%p583_p4), %s511_s12, %s366_s27  ;;  %s367_s30 = sshll.u32 (%p583_p4), %s515_s13, 4 }
  0x18   : > { %s129_s2 = sadd.s32 (%p583_p4), %s367_s30, %s127_s29  ;;  %s124_s18 = scalar_lea.vmem (%p583_p4), [#allocation2], %s365_s28 }
  0x19   : > { %s368_s3 = sshll.u32 (%p583_p4), %s129_s2, 3 }
  0x1a   : > { %s131_s19 = scalar_lea.vmem %s651_s0, %s368_s3 }
  0x1b   : > { %v166_v0 = vld [vmem:[%s131_s19] sm:$0xff]  ;;  %v168_v1 = vld [vmem:[%s131_s19 + $0x10] sm:$0xff] }
  0x1c   : > { %v170_v2 = vld [vmem:[%s131_s19 + $0x20] sm:$0xff]  ;;  %167 = vst [vmem:[%s124_s18] sm:$0xff] %v166_v0  ;;  %169 = vst [vmem:[%s124_s18 + $0x8] sm:$0xff] %v168_v1  ;;  %v172_v3 = vld [vmem:[%s131_s19 + $0x30] sm:$0xff] }
  0x1d   : > { %171 = vst [vmem:[%s124_s18 + $0x10] sm:$0xff] %v170_v2  ;;  %173 = vst [vmem:[%s124_s18 + $0x18] sm:$0xff] %v172_v3 }
  0x1e PF: > { %p369_p8 = scmp.ge.s32.totalorder %s519_s14, 1  ;;  %p178_p9 = scmp.lt.s32.totalorder %s519_s14, 9 }
  0x20   : > { %p179_p10 = pnand %p369_p8, %p178_p9 }
  0x21   : > { %s185_s20 = sand.u32 (!%p179_p10), 1, %s487_s6   ;;  %s371_s21 = sshll.u32 (!%p179_p10), %s499_s9, 1 }
  0x22   : > { %182 = sbr.rel (%p179_p10) target bundleno = 46 (0x2e), region = 58  ;;  %s370_s22 = sshll.u32 (!%p179_p10), %s185_s20, 5 }
  0x23   : > { %s214_s23 = sadd.s32 (!%p179_p10), %s495_s8, %s371_s21  ;;  %p216_p11 = scmp.lt.s32.totalorder (!%p179_p10), %s503_s10, 1 }
  0x24   : > { %s372_s24 = sshll.u32 (!%p179_p10), %s214_s23, 2  ;;  %s187_s27 = scalar_lea.vmem (!%p179_p10), [#allocation2], %s370_s22 }
  0x25   : > { %p218_p12 = scmp.lt.s32.totalorder (!%p179_p10), %s372_s24, 15 }
  0x27   : > { %s673_s10 = smov (!%p216_p11, %s503_s10), 1  ;;  %s675_s24 = smov (!%p218_p12, %s372_s24), 15  ;;  %v230_v4 = vld [vmem:[%s187_s27] sm:$0xff]  ;;  %vm234_vm0 = vcmask 64512   ;;  %v231_v5 = vld [vmem:[%s187_s27 + $0x8] sm:$0xff]  ;;  %v232_v6 = vld [vmem:[%s187_s27 + $0x10] sm:$0xff] }
  0x28   : > { %s373_s26 = sshll.u32 %s673_s10, 4  ;;  %v233_v7 = vld [vmem:[%s187_s27 + $0x18] sm:$0xff] }
  0x29   : > { %s224_s28 = sadd.s32 %s373_s26, %s675_s24 }
  0x2a   : > { %s374_s29 = sshll.u32 %s224_s28, 3 }
  0x2b   : > { %s226_s6 = scalar_lea.vmem %s652_s1, %s374_s29 }
  0x2c   : > { %235 = vst.msk [vmem:[%s226_s6] sm:$0xff] %vm234_vm0, %v230_v4  ;;  %236 = vst.msk [vmem:[%s226_s6 + $0x8] sm:$0xff] %vm234_vm0, %v231_v5 }
  0x2d   : > { %237 = vst.msk [vmem:[%s226_s6 + $0x10] sm:$0xff] %vm234_vm0, %v232_v6  ;;  %238 = vst.msk [vmem:[%s226_s6 + $0x18] sm:$0xff] %vm234_vm0, %v233_v7 }
  0x2e PF: > { %s11_s14 = sadd.s32 1, %s519_s14   ;;  %s654_s6 = smov %s491_s7 }
  0x2f   : > { %p8_p13 = scmp.ge.s32.totalorder %s11_s14, 10   ;;  %s655_s7 = smov %s602_s25 }
  0x30   : > { %s656_s8 = smov %s507_s11  ;;  %s657_s9 = smov %s511_s12 }
  0x31   : > { %s658_s10 = smov %s515_s13  ;;  %s659_s11 = smov %s665_s15 }
  0x32   : > { %s660_s12 = smov %s669_s16  ;;  %s661_s13 = smov %s671_s17 }
  0x33   :  { %10 = sbr.rel (!%p8_p13) target bundleno = 5 (0x5), region = 97 }

</bundles_post_ra>
